<compile_context>
chip_gen: v7x
topology: tpu7x:2x2x1
jax: 0.10.0
libtpu: 0.0.40
codegen_flags: <defaults>
</compile_context>

<pallas_src>
import jax
import jax.numpy as jnp
from jax.experimental import pallas as pl
from jax.experimental.pallas import tpu as pltpu

IMG_FEATS = 28 * 28            # 784
NUM_CLASSES = 10
DEFAULT_BATCH_TILE = 1024      # ~3.2 MB / f32 input buffer -> double-buffered it
                               # fits the v5e 16 MiB scoped-VMEM default; also a
                               # good tile on v6e/v7x (raise to 2048 there if desired).


# ---------------------------------------------------------------------------
# Kernels
# ---------------------------------------------------------------------------
def _linear_kernel(x_ref, w_ref, b_ref, o_ref):
    # (TB, 784) @ (784, 10) + (1, 10).  Native-dtype load, VPU cast, MXU dot
    # with f32 accumulate, masked 10-lane store.
    x = x_ref[...].astype(jnp.float32)
    acc = jnp.dot(x, w_ref[...], preferred_element_type=jnp.float32)
    o_ref[...] = (acc + b_ref[...]).astype(o_ref.dtype)


def _linear_emb_kernel(x_ref, e_ref, w_ref, b_ref, o_ref):
    # concat(x, emb) @ W == x @ W[:784] + emb @ W[784:]  -- no concat copy.
    # W is passed whole; the static slices below are sublane-aligned views
    # (784 % 8 == 0), so no wrapper-side slice ops and no VMEM copies.
    x = x_ref[...].astype(jnp.float32)
    e = e_ref[...].astype(jnp.float32)
    acc = jnp.dot(x, w_ref[:IMG_FEATS, :], preferred_element_type=jnp.float32)
    acc = acc + jnp.dot(e, w_ref[IMG_FEATS:, :], preferred_element_type=jnp.float32)
    o_ref[...] = (acc + b_ref[...]).astype(o_ref.dtype)


# ---------------------------------------------------------------------------
# One-time (init) parameter prep -- keep OUT of the per-call path.
# ---------------------------------------------------------------------------
def prepare_params(weight, bias):
    """weight: (10, in_features) torch nn.Linear layout OR already (in_features, 10).
    bias: (10,).  Returns (w, b_row) with w: (in_features, 10) f32, b_row: (1, 10) f32."""
    w = jnp.asarray(weight, jnp.float32)
    if w.ndim == 2 and w.shape[0] == NUM_CLASSES and w.shape[1] != NUM_CLASSES:
        w = w.T                                    # torch (out, in) -> (in, out)
    b_row = jnp.asarray(bias, jnp.float32).reshape(1, NUM_CLASSES)
    assert w.shape[1] == NUM_CLASSES and w.shape[0] >= IMG_FEATS
    return w, b_row


# ---------------------------------------------------------------------------
# Forward
# ---------------------------------------------------------------------------
def mnist_model_forward(xb, w, b_row, emb=None, *, batch_tile=DEFAULT_BATCH_TILE):
    """MnistModel.forward.

    xb:    any shape whose trailing dims flatten to 784 (e.g. (B, 1, 28, 28)),
           any numeric dtype (cast happens inside the kernel).
    w:     (in_features, 10) f32 from prepare_params (in_features = 784 [+ E]).
    b_row: (1, 10) f32 from prepare_params.
    emb:   optional (B, E).
    returns (B, 10) float32 logits.
    """
    x = xb.reshape(-1, IMG_FEATS)                  # metadata-only reshape
    B = x.shape[0]
    in_features = w.shape[0]
    if emb is None:
        assert in_features == IMG_FEATS, "pass w[:784] when running without emb"
    else:
        assert emb.shape == (B, in_features - IMG_FEATS)

    out_shape = jax.ShapeDtypeStruct((B, NUM_CLASSES), jnp.float32)

    # ---- small batch: single block, no grid (problem is launch/DMA bound) ----
    if B <= batch_tile:
        vmem = pl.BlockSpec(memory_space=pltpu.MemorySpace.VMEM)
        if emb is None:
            return pl.pallas_call(
                _linear_kernel, out_shape=out_shape,
                in_specs=[vmem] * 3, out_specs=vmem,
            )(x, w, b_row)
        return pl.pallas_call(
            _linear_emb_kernel, out_shape=out_shape,
            in_specs=[vmem] * 4, out_specs=vmem,
        )(x, emb, w, b_row)

    # ---- large batch: tiled over rows, auto double-buffered, W/b resident ----
    tb = batch_tile
    grid = (pl.cdiv(B, tb),)
    x_spec = pl.BlockSpec((tb, IMG_FEATS), lambda i: (i, 0))
    w_spec = pl.BlockSpec((in_features, NUM_CLASSES), lambda i: (0, 0))  # resident
    b_spec = pl.BlockSpec((1, NUM_CLASSES), lambda i: (0, 0))            # resident
    o_spec = pl.BlockSpec((tb, NUM_CLASSES), lambda i: (i, 0))
    cparams = pltpu.CompilerParams(dimension_semantics=("parallel",))

    if emb is None:
        return pl.pallas_call(
            _linear_kernel, out_shape=out_shape, grid=grid,
            in_specs=[x_spec, w_spec, b_spec], out_specs=o_spec,
            compiler_params=cparams,
        )(x, w, b_row)

    e_spec = pl.BlockSpec((tb, emb.shape[1]), lambda i: (i, 0))
    return pl.pallas_call(
        _linear_emb_kernel, out_shape=out_shape, grid=grid,
        in_specs=[x_spec, e_spec, w_spec, b_spec], out_specs=o_spec,
        compiler_params=cparams,
    )(x, emb, w, b_row)

# TODO(synk): forward returns raw logits (as the torch module does); if a
# softmax / cross-entropy epilogue is ever needed, fuse it into the kernel
# body (EUP exp + VPU reduce over 10 lanes) instead of a second launch.


# ---------------------------------------------------------------------------
# Demo / self-test
# ---------------------------------------------------------------------------
if __name__ == "__main__":
    key = jax.random.PRNGKey(0)
    k_img, k_emb, k_w, k_b, k_img2, k_emb2 = jax.random.split(key, 6)

    batch, emb_size = 8, 16
    in_features = IMG_FEATS + emb_size

    images = jax.random.normal(k_img, (batch, 1, 28, 28), jnp.float32)
    emb = jax.random.normal(k_emb, (batch, emb_size), jnp.float32)

    # torch nn.Linear(in_features, 10) stores weight as (10, in_features);
    # prepare_params transposes it once at init.
    weight_t = jax.random.normal(k_w, (NUM_CLASSES, in_features),
                                 jnp.float32) / jnp.sqrt(in_features)
    bias = jax.random.normal(k_b, (NUM_CLASSES,), jnp.float32) * 0.01

    # ---- init-time prep (done once) ----
    w, b_row = prepare_params(weight_t, bias)       # (800, 10), (1, 10)
    w_img = w[:IMG_FEATS]                            # weights for the no-emb model

    def ref_forward(xb, emb=None):
        xf = xb.reshape(-1, IMG_FEATS)
        if emb is not None:
            xf = jnp.concatenate([xf, emb], axis=1)
            return xf @ w + b_row
        return xf @ w_img + b_row

    # 1) embedding path, small batch (single-block kernel)
    out = jax.block_until_ready(mnist_model_forward(images, w, b_row, emb=emb))
    assert out.shape == (batch, NUM_CLASSES) and out.dtype == jnp.float32
    assert float(jnp.max(jnp.abs(out - ref_forward(images, emb)))) < 5e-2

    # 2) no-embedding path (embedding_size == 0)
    out2 = jax.block_until_ready(mnist_model_forward(images, w_img, b_row))
    assert out2.shape == (batch, NUM_CLASSES)
    assert float(jnp.max(jnp.abs(out2 - ref_forward(images)))) < 5e-2

    # 3) batch-tiled path exercised at small scale (B=16 > tile=8 -> grid of 2)
    images_big = jax.random.normal(k_img2, (16, 1, 28, 28), jnp.float32)
    emb_big = jax.random.normal(k_emb2, (16, emb_size), jnp.float32)
    out3 = jax.block_until_ready(
        mnist_model_forward(images_big, w, b_row, emb=emb_big, batch_tile=8))
    assert out3.shape == (16, NUM_CLASSES)
    assert float(jnp.max(jnp.abs(out3 - ref_forward(images_big, emb_big)))) < 5e-2

    print("KERNEL_OK")
</pallas_src>

<mosaic_0001>
module attributes {stable_mosaic.version = 11 : i64} {
  func.func @_linear_emb_kernel(%arg0: memref<8x784xf32, #tpu.memory_space<vmem>>, %arg1: memref<8x16xf32, #tpu.memory_space<vmem>>, %arg2: memref<800x10xf32, #tpu.memory_space<vmem>>, %arg3: memref<1x10xf32, #tpu.memory_space<vmem>>, %arg4: memref<8x10xf32, #tpu.memory_space<vmem>>) attributes {dimension_semantics = [], scalar_prefetch = 0 : i64, scratch_operands = 0 : i64, tpu.core_type = #tpu.core_type<tc>} {
    %c0 = arith.constant 0 : index
    %c0_0 = arith.constant 0 : index
    %0 = vector.load %arg0[%c0, %c0_0] : memref<8x784xf32, #tpu.memory_space<vmem>>, vector<8x784xf32>
    %c0_1 = arith.constant 0 : index
    %c0_2 = arith.constant 0 : index
    %1 = vector.load %arg1[%c0_1, %c0_2] : memref<8x16xf32, #tpu.memory_space<vmem>>, vector<8x16xf32>
    %c0_3 = arith.constant 0 : index
    %c0_4 = arith.constant 0 : index
    %2 = vector.load %arg2[%c0_3, %c0_4] : memref<800x10xf32, #tpu.memory_space<vmem>>, vector<784x10xf32>
    %cst = arith.constant dense<0.000000e+00> : vector<8x10xf32>
    %3 = tpu.matmul %0, %2, %cst {dimension_numbers = #tpu.dot_dimension_numbers<[1], [0], [0], [1], [0, 0, 1, 1], [], []>} : vector<8x784xf32>, vector<784x10xf32>, vector<8x10xf32> -> vector<8x10xf32>
    %c784 = arith.constant 784 : index
    %c0_5 = arith.constant 0 : index
    %4 = vector.load %arg2[%c784, %c0_5] : memref<800x10xf32, #tpu.memory_space<vmem>>, vector<16x10xf32>
    %cst_6 = arith.constant dense<0.000000e+00> : vector<8x10xf32>
    %5 = tpu.matmul %1, %4, %cst_6 {dimension_numbers = #tpu.dot_dimension_numbers<[1], [0], [0], [1], [0, 0, 1, 1], [], []>} : vector<8x16xf32>, vector<16x10xf32>, vector<8x10xf32> -> vector<8x10xf32>
    %6 = arith.addf %3, %5 : vector<8x10xf32>
    %c0_7 = arith.constant 0 : index
    %c0_8 = arith.constant 0 : index
    %7 = vector.load %arg3[%c0_7, %c0_8] : memref<1x10xf32, #tpu.memory_space<vmem>>, vector<1x10xf32>
    %8 = vector.broadcast %7 : vector<1x10xf32> to vector<8x10xf32>
    %9 = arith.addf %6, %8 : vector<8x10xf32>
    %c0_9 = arith.constant 0 : index
    %c0_10 = arith.constant 0 : index
    %10 = vector.load %arg4[%c0_9, %c0_10] : memref<8x10xf32, #tpu.memory_space<vmem>>, vector<8x10xf32>
    tpu.vector_store %arg4[%c0_9, %c0_10], %9 {strides = array<i32>} : memref<8x10xf32, #tpu.memory_space<vmem>>, vector<8x10xf32>,
    return
  }
}

</mosaic_0001>

<bundles_post_ra>
// kernel: tpu_custom_call.1
= control target key start
LH: loop header
LB: loop body
LE: loop exit
PB: predicated region body
PF: predicated region fallthrough
CT: control target
= control target key end

     0   :  { %v765_v3 = vmov 0.0|0.0   ;;  %vm766_vm0 = vmmov 0   ;;  %v767_v8 = vmov 0.0   ;;  %vm126_vm1 = vcmask 130048   ;;  %s1141_s0 = inlined_call_operand.vmem [shape: f32[8,784], index: 0, kind: input, shape index: {}]   ;;  %s1142_s1 = inlined_call_operand.vmem [shape: f32[8,16], index: 1, kind: input, shape index: {}]   ;;  %s1143_s2 = inlined_call_operand.vmem [shape: f32[800,10], index: 2, kind: input, shape index: {}]   ;;  %s1144_s3 = inlined_call_operand.vmem [shape: f32[1,10], index: 3, kind: input, shape index: {}]   ;;  %s1145_s4 = inlined_call_operand.hbm [shape: f32[8,10], index: 4, kind: output, shape index: {}]  }
   0x1   :  { %v124_v0 = vld [vmem:[%s1143_s2 + $0x310] sm:$0xff]  ;;  %v125_v1 = vld [vmem:[%s1143_s2 + $0x318] sm:$0xff]  ;;  %v42_v2 = vld [vmem:[%s1143_s2 + $0x80] sm:$0xff]  ;;  %635 = vmatprep.subr.bf16.mxu0 %v765_v3  ;;  %625 = vmatprep.mubr.msk.f32.mxu0 %vm766_vm0, %v767_v8 }
   0x2   :  { %v636_v4 = vpack.c.bf16 %v125_v1, %v124_v0  ;;  %v43_v5 = vld [vmem:[%s1143_s2 + $0x88] sm:$0xff]  ;;  %v26_v6 = vld [vmem:[%s1143_s2] sm:$0xff]  ;;  %v44_v15 = vld [vmem:[%s1143_s2 + $0x90] sm:$0xff] }
   0x3   :  { %v27_v7 = vld [vmem:[%s1143_s2 + $0x8] sm:$0xff]  ;;  %v638_v9 = vpack.c.bf16 %v43_v5, %v42_v2  ;;  %v74_v11 = vld [vmem:[%s1143_s2 + $0x180] sm:$0xff]  ;;  %v45_v16 = vld [vmem:[%s1143_s2 + $0x98] sm:$0xff] }
   0x4   :  { %v640_v10 = vpack.c.bf16 %v27_v7, %v26_v6  ;;  %v75_v12 = vld [vmem:[%s1143_s2 + $0x188] sm:$0xff]  ;;  %v25_v13 = vld [vmem:[%s1142_s1] sm:$0xff]  ;;  %637 = vmatpush3.bf16.msra.mxu0 %v636_v4  ;;  %v642_v18 = vpack.c.bf16 %v45_v16, %v44_v15  ;;  %v28_v20 = vld [vmem:[%s1143_s2 + $0x10] sm:$0xff] }
   0x5   :  { %v670_v14 = vpack.c.bf16 %v75_v12, %v74_v11  ;;  %v58_v17 = vld [vmem:[%s1143_s2 + $0x100] sm:$0xff]  ;;  %639 = vmatprep.subr.bf16.mxu1 %v638_v9  ;;  %v59_v19 = vld [vmem:[%s1143_s2 + $0x108] sm:$0xff]  ;;  %v29_v21 = vld [vmem:[%s1143_s2 + $0x18] sm:$0xff] }
   0x6   :  { %641 = vmatpush3.bf16.msra.mxu1 %v640_v10  ;;  %v672_v22 = vpack.c.bf16 %v59_v19, %v58_v17  ;;  %v644_v23 = vpack.c.bf16 %v29_v21, %v28_v20  ;;  %v76_v24 = vld [vmem:[%s1143_s2 + $0x190] sm:$0xff]  ;;  %v77_v25 = vld [vmem:[%s1143_s2 + $0x198] sm:$0xff]  ;;  %v46_v26 = vld [vmem:[%s1143_s2 + $0xa0] sm:$0xff] }
   0x7   :  { %671 = vmatprep.subr.bf16.mxu0 %v670_v14  ;;  %626 = vmatmul.mubr.msk.f32.vlgmr.msra.gmra.mrb[0].mxu0 %vm126_vm1, %v25_v13  ;;  %v674_v27 = vpack.c.bf16 %v77_v25, %v76_v24  ;;  %v47_v28 = vld [vmem:[%s1143_s2 + $0xa8] sm:$0xff]  ;;  %v60_v29 = vld [vmem:[%s1143_s2 + $0x110] sm:$0xff]  ;;  %v61_v30 = vld [vmem:[%s1143_s2 + $0x118] sm:$0xff] }
   0x8   :  { %643 = vmatprep.subr.bf16.mxu1 %v642_v18  ;;  %673 = vmatpush3.bf16.msra.mxu0 %v672_v22  ;;  %v646_v31 = vpack.c.bf16 %v47_v28, %v46_v26  ;;  %v676_v32 = vpack.c.bf16 %v61_v30, %v60_v29  ;;  %v30_v33 = vld [vmem:[%s1143_s2 + $0x20] sm:$0xff]  ;;  %v31_v34 = vld [vmem:[%s1143_s2 + $0x28] sm:$0xff]  ;;  %v48_v37 = vld [vmem:[%s1143_s2 + $0xb0] sm:$0xff] }
   0x9   :  { %v78_v35 = vld [vmem:[%s1143_s2 + $0x1a0] sm:$0xff]  ;;  %675 = vmatprep.subr.bf16.mxu0 %v674_v27  ;;  %v79_v36 = vld [vmem:[%s1143_s2 + $0x1a8] sm:$0xff]  ;;  %v49_v38 = vld [vmem:[%s1143_s2 + $0xb8] sm:$0xff]  ;;  %v648_v39 = vpack.c.bf16 %v31_v34, %v30_v33 }
   0xa   :  { %645 = vmatpush3.bf16.msra.mxu1 %v644_v23  ;;  %v678_v40 = vpack.c.bf16 %v79_v36, %v78_v35  ;;  %v62_v41 = vld [vmem:[%s1143_s2 + $0x120] sm:$0xff]  ;;  %v63_v42 = vld [vmem:[%s1143_s2 + $0x128] sm:$0xff]  ;;  %v32_v43 = vld [vmem:[%s1143_s2 + $0x30] sm:$0xff]  ;;  %v650_v44 = vpack.c.bf16 %v49_v38, %v48_v37 }
   0xb   :  { %647 = vmatprep.subr.bf16.mxu1 %v646_v31  ;;  %v33_v45 = vld [vmem:[%s1143_s2 + $0x38] sm:$0xff]  ;;  %v80_v46 = vld [vmem:[%s1143_s2 + $0x1b0] sm:$0xff]  ;;  %v680_v48 = vpack.c.bf16 %v63_v42, %v62_v41  ;;  %v50_v49 = vld [vmem:[%s1143_s2 + $0xc0] sm:$0xff] }
   0xc   :  { %v81_v47 = vld [vmem:[%s1143_s2 + $0x1b8] sm:$0xff]  ;;  %677 = vmatpush3.bf16.msra.mxu0 %v676_v32  ;;  %v51_v50 = vld [vmem:[%s1143_s2 + $0xc8] sm:$0xff]  ;;  %v64_v52 = vld [vmem:[%s1143_s2 + $0x130] sm:$0xff]  ;;  %v652_v54 = vpack.c.bf16 %v33_v45, %v32_v43 }
   0xd   :  { %679 = vmatprep.subr.bf16.mxu0 %v678_v40  ;;  %v682_v51 = vpack.c.bf16 %v81_v47, %v80_v46  ;;  %v65_v53 = vld [vmem:[%s1143_s2 + $0x138] sm:$0xff]  ;;  %v82_v55 = vld [vmem:[%s1143_s2 + $0x1c0] sm:$0xff]  ;;  %v83_v56 = vld [vmem:[%s1143_s2 + $0x1c8] sm:$0xff]  ;;  %v654_v57 = vpack.c.bf16 %v51_v50, %v50_v49 }
   0xe   :  { %649 = vmatpush3.bf16.msra.mxu1 %v648_v39  ;;  %v34_v58 = vld [vmem:[%s1143_s2 + $0x40] sm:$0xff]  ;;  %v35_v59 = vld [vmem:[%s1143_s2 + $0x48] sm:$0xff]  ;;  %v684_v60 = vpack.c.bf16 %v65_v53, %v64_v52  ;;  %v52_v61 = vld [vmem:[%s1143_s2 + $0xd0] sm:$0xff]  ;;  %v686_v63 = vpack.c.bf16 %v83_v56, %v82_v55 }
   0xf   :  { %651 = vmatprep.subr.bf16.mxu1 %v650_v44  ;;  %v53_v62 = vld [vmem:[%s1143_s2 + $0xd8] sm:$0xff]  ;;  %v66_v0 = vld [vmem:[%s1143_s2 + $0x140] sm:$0xff]  ;;  %v67_v1 = vld [vmem:[%s1143_s2 + $0x148] sm:$0xff]  ;;  %v656_v2 = vpack.c.bf16 %v35_v59, %v34_v58 }
  0x10   :  { %681 = vmatpush3.bf16.msra.mxu0 %v680_v48  ;;  %v84_v4 = vld [vmem:[%s1143_s2 + $0x1d0] sm:$0xff]  ;;  %v85_v5 = vld [vmem:[%s1143_s2 + $0x1d8] sm:$0xff]  ;;  %v658_v6 = vpack.c.bf16 %v53_v62, %v52_v61  ;;  %v688_v10 = vpack.c.bf16 %v67_v1, %v66_v0  ;;  %v54_v11 = vld [vmem:[%s1143_s2 + $0xe0] sm:$0xff] }
  0x11   :  { %683 = vmatprep.subr.bf16.mxu0 %v682_v51  ;;  %v36_v7 = vld [vmem:[%s1143_s2 + $0x50] sm:$0xff]  ;;  %v37_v9 = vld [vmem:[%s1143_s2 + $0x58] sm:$0xff]  ;;  %v55_v12 = vld [vmem:[%s1143_s2 + $0xe8] sm:$0xff]  ;;  %v690_v13 = vpack.c.bf16 %v85_v5, %v84_v4 }
  0x12   :  { %653 = vmatpush3.bf16.msra.mxu1 %v652_v54  ;;  %v68_v14 = vld [vmem:[%s1143_s2 + $0x150] sm:$0xff]  ;;  %v69_v15 = vld [vmem:[%s1143_s2 + $0x158] sm:$0xff]  ;;  %v660_v16 = vpack.c.bf16 %v37_v9, %v36_v7  ;;  %v86_v17 = vld [vmem:[%s1143_s2 + $0x1e0] sm:$0xff]  ;;  %v662_v20 = vpack.c.bf16 %v55_v12, %v54_v11 }
  0x13   :  { %655 = vmatprep.subr.bf16.mxu1 %v654_v57  ;;  %v87_v18 = vld [vmem:[%s1143_s2 + $0x1e8] sm:$0xff]  ;;  %v38_v21 = vld [vmem:[%s1143_s2 + $0x60] sm:$0xff]  ;;  %v692_v23 = vpack.c.bf16 %v69_v15, %v68_v14  ;;  %v56_v24 = vld [vmem:[%s1143_s2 + $0xf0] sm:$0xff] }
  0x14   :  { %685 = vmatpush3.bf16.msra.mxu0 %v684_v60  ;;  %v19_v19 = vld [vmem:[%s1141_s0 + $0x8] sm:$0xff]  ;;  %v57_v25 = vld [vmem:[%s1143_s2 + $0xf8] sm:$0xff]  ;;  %v694_v26 = vpack.c.bf16 %v87_v18, %v86_v17  ;;  %v70_v27 = vld [vmem:[%s1143_s2 + $0x160] sm:$0xff] }
  0x15   :  { %687 = vmatprep.subr.bf16.mxu0 %v686_v63  ;;  %v39_v22 = vld [vmem:[%s1143_s2 + $0x68] sm:$0xff]  ;;  %267 = vmatprep.mubr.f32.mxu1 %v19_v19  ;;  %v21_v29 = vld [vmem:[%s1141_s0 + $0x18] sm:$0xff]  ;;  %v88_v31 = vld [vmem:[%s1143_s2 + $0x1f0] sm:$0xff]  ;;  %v666_v33 = vpack.c.bf16 %v57_v25, %v56_v24 }
  0x16   :  { %657 = vmatpush3.bf16.msra.mxu1 %v656_v2  ;;  %v71_v28 = vld [vmem:[%s1143_s2 + $0x168] sm:$0xff]  ;;  %v664_v30 = vpack.c.bf16 %v39_v22, %v38_v21  ;;  %v89_v32 = vld [vmem:[%s1143_s2 + $0x1f8] sm:$0xff]  ;;  %337 = vmatprep.mubr.f32.mxu0 %v21_v29  ;;  %v40_v34 = vld [vmem:[%s1143_s2 + $0x70] sm:$0xff] }
  0x17   :  { %659 = vmatprep.subr.bf16.mxu1 %v658_v6  ;;  %v41_v35 = vld [vmem:[%s1143_s2 + $0x78] sm:$0xff]  ;;  %v696_v36 = vpack.c.bf16 %v71_v28, %v70_v27  ;;  %v106_v37 = vld [vmem:[%s1143_s2 + $0x280] sm:$0xff]  ;;  %v107_v38 = vld [vmem:[%s1143_s2 + $0x288] sm:$0xff]  ;;  %v698_v39 = vpack.c.bf16 %v89_v32, %v88_v31 }
  0x18   :  { %689 = vmatpush3.bf16.msra.mxu0 %v688_v10  ;;  %v72_v40 = vld [vmem:[%s1143_s2 + $0x170] sm:$0xff]  ;;  %v73_v41 = vld [vmem:[%s1143_s2 + $0x178] sm:$0xff]  ;;  %v668_v42 = vpack.c.bf16 %v41_v35, %v40_v34  ;;  %v702_v43 = vpack.c.bf16 %v107_v38, %v106_v37  ;;  %v90_v44 = vld [vmem:[%s1143_s2 + $0x200] sm:$0xff] }
  0x19   :  { %691 = vmatprep.subr.bf16.mxu0 %v690_v13  ;;  %v91_v45 = vld [vmem:[%s1143_s2 + $0x208] sm:$0xff]  ;;  %v700_v46 = vpack.c.bf16 %v73_v41, %v72_v40  ;;  %v108_v47 = vld [vmem:[%s1143_s2 + $0x290] sm:$0xff]  ;;  %v109_v48 = vld [vmem:[%s1143_s2 + $0x298] sm:$0xff] }
  0x1a   :  { %661 = vmatpush3.bf16.msra.mxu1 %v660_v16  ;;  %v18_v49 = vld [vmem:[%s1141_s0] sm:$0xff]  ;;  %v704_v50 = vpack.c.bf16 %v91_v45, %v90_v44  ;;  %v20_v51 = vld [vmem:[%s1141_s0 + $0x10] sm:$0xff]  ;;  %v706_v53 = vpack.c.bf16 %v109_v48, %v108_v47  ;;  %v93_v54 = vld [vmem:[%s1143_s2 + $0x218] sm:$0xff] }
  0x1b   :  { %663 = vmatprep.subr.bf16.mxu1 %v662_v20  ;;  %v92_v52 = vld [vmem:[%s1143_s2 + $0x210] sm:$0xff]  ;;  %v110_v55 = vld [vmem:[%s1143_s2 + $0x2a0] sm:$0xff]  ;;  %v23_v56 = vld [vmem:[%s1141_s0 + $0x28] sm:$0xff] }
  0x1c   :  { %693 = vmatpush3.bf16.msra.mxu0 %v692_v23  ;;  %v111_v57 = vld [vmem:[%s1143_s2 + $0x2a8] sm:$0xff]  ;;  %v122_v58 = vld [vmem:[%s1143_s2 + $0x300] sm:$0xff] }
  0x1d   :  { %695 = vmatprep.subr.bf16.mxu0 %v694_v26  ;;  %v123_v59 = vld [vmem:[%s1143_s2 + $0x308] sm:$0xff] }
  0x1e   :  { %665 = vmatpush3.bf16.msra.mxu1 %v664_v30  ;;  %v735_v60 = vpack.c.bf16 %v123_v59, %v122_v58 }
  0x1f   :  { %667 = vmatprep.subr.bf16.mxu1 %v666_v33 }
  0x20   :  { %697 = vmatpush3.bf16.msra.mxu0 %v696_v36 }
  0x21   :  { %699 = vmatprep.subr.bf16.mxu0 %v698_v39 }
  0x22   :  { %669 = vmatpush3.bf16.msra.mxu1 %v668_v42 }
  0x23   :  { %703 = vmatprep.subr.bf16.mxu1 %v702_v43 }
  0x24   :  { %701 = vmatpush3.bf16.msra.mxu0 %v700_v46 }
  0x25   :  { %268 = vmatmul.mubr.f32.vlgmr.msra.gmra.mrb[0].mxu1 %v18_v49  ;;  %734 = vmatprep.subr.bf16.mxu0 %v765_v3 }
  0x26   :  { %9 = vsyncpa [#allocation3], 0  ;;  %705 = vmatpush3.bf16.msra.mxu1 %v704_v50  ;;  %v708_v61 = vpack.c.bf16 %v93_v54, %v92_v52  ;;  %407 = vmatprep.mubr.f32.mxu1 %v23_v56  ;;  %v710_v62 = vpack.c.bf16 %v111_v57, %v110_v55  ;;  %v94_v63 = vld [vmem:[%s1143_s2 + $0x220] sm:$0xff]  ;;  %v95_v0 = vld [vmem:[%s1143_s2 + $0x228] sm:$0xff]  ;;  %vm491_vm2 = vcmask 80896  }
  0x27   :  { %338 = vmatmul.mubr.f32.vlgmr.msra.gmra.mrb[2].mxu0 %v20_v51  ;;  %707 = vmatprep.subr.bf16.mxu1 %v706_v53  ;;  %v112_v3 = vld [vmem:[%s1143_s2 + $0x2b0] sm:$0xff]  ;;  %v113_v1 = vld [vmem:[%s1143_s2 + $0x2b8] sm:$0xff]  ;;  %v712_v4 = vpack.c.bf16 %v95_v0, %v94_v63  ;;  %v115_v9 = vld [vmem:[%s1143_s2 + $0x2c8] sm:$0xff] }
  0x28   :  { %736 = vmatpush3.bf16.msra.mxu0 %v735_v60  ;;  %632 = vmatprep.mubr.msk.f32.mxu0 %vm766_vm0, %v767_v8  ;;  %v24_v2 = vld [vmem:[%s1141_s0 + $0x30] sm:$0xff]  ;;  %v714_v5 = vpack.c.bf16 %v113_v1, %v112_v3  ;;  %v97_v7 = vld [vmem:[%s1143_s2 + $0x238] sm:$0xff]  ;;  %v114_v8 = vld [vmem:[%s1143_s2 + $0x2c0] sm:$0xff] }
  0x29   :  { %v96_v6 = vld [vmem:[%s1143_s2 + $0x230] sm:$0xff]  ;;  %v718_v11 = vpack.c.bf16 %v115_v9, %v114_v8  ;;  %v98_v12 = vld [vmem:[%s1143_s2 + $0x240] sm:$0xff]  ;;  %v99_v13 = vld [vmem:[%s1143_s2 + $0x248] sm:$0xff] }
  0x2a   :  { %709 = vmatpush3.bf16.msra.mxu1 %v708_v61  ;;  %v716_v10 = vpack.c.bf16 %v97_v7, %v96_v6  ;;  %v116_v14 = vld [vmem:[%s1143_s2 + $0x2d0] sm:$0xff]  ;;  %v117_v15 = vld [vmem:[%s1143_s2 + $0x2d8] sm:$0xff]  ;;  %v720_v16 = vpack.c.bf16 %v99_v13, %v98_v12  ;;  %v118_v20 = vld [vmem:[%s1143_s2 + $0x2e0] sm:$0xff] }
  0x2b   :  { %711 = vmatprep.subr.bf16.mxu1 %v710_v62  ;;  %633 = vmatmul.mubr.msk.f32.vlgmr.msra.gmra.mrb[4].mxu0 %vm126_vm1, %v24_v2  ;;  %v722_v17 = vpack.c.bf16 %v117_v15, %v116_v14  ;;  %v100_v18 = vld [vmem:[%s1143_s2 + $0x250] sm:$0xff]  ;;  %v101_v19 = vld [vmem:[%s1143_s2 + $0x258] sm:$0xff]  ;;  %v119_v21 = vld [vmem:[%s1143_s2 + $0x2e8] sm:$0xff] }
  0x2c   :  { %v724_v22 = vpack.c.bf16 %v101_v19, %v100_v18  ;;  %v726_v23 = vpack.c.bf16 %v119_v21, %v118_v20  ;;  %v102_v24 = vld [vmem:[%s1143_s2 + $0x260] sm:$0xff]  ;;  %v103_v25 = vld [vmem:[%s1143_s2 + $0x268] sm:$0xff]  ;;  %v120_v26 = vld [vmem:[%s1143_s2 + $0x2f0] sm:$0xff] }
  0x2d   :  { %v121_v27 = vld [vmem:[%s1143_s2 + $0x2f8] sm:$0xff]  ;;  %v728_v28 = vpack.c.bf16 %v103_v25, %v102_v24  ;;  %v104_v30 = vld [vmem:[%s1143_s2 + $0x270] sm:$0xff]  ;;  %v22_v33 = vld [vmem:[%s1141_s0 + $0x20] sm:$0xff]  ;;  %s768_s0 = smov [#allocation2]  }
  0x2e   :  { %713 = vmatpush3.bf16.msra.mxu1 %v712_v4  ;;  %v730_v29 = vpack.c.bf16 %v121_v27, %v120_v26  ;;  %v105_v31 = vld [vmem:[%s1143_s2 + $0x278] sm:$0xff]  ;;  %v509_v50 = vld [vmem:[%s1144_s3] ss:$0 sm:$0xff]  ;;  %s499_s16 = sshll.u32 %s768_s0, 4  ;;  %s500_s16 = int_to_ptr.vmem [resolvable:$true] %s499_s16 }
  0x2f   :  { %715 = vmatprep.subr.bf16.mxu1 %v714_v5  ;;  %v732_v32 = vpack.c.bf16 %v105_v31, %v104_v30  ;;  %s741_s17 = scalar_lea.vmem %s500_s16, 128  ;;  %p746_p1 = scmp.lt.s32.totalorder %s500_s16, %s500_s16 }
  0x30   :  { %p742_p0 = scmp.ne.s32.totalorder %s500_s16, %s741_s17  ;;  %p747_p2 = scmp.lt.s32.totalorder %s741_s17, %s741_s17 }
  0x32   :  { %717 = vmatpush3.bf16.msra.mxu1 %v716_v10  ;;  %p748_p3 = por %p747_p2, %p746_p1 }
  0x33   :  { %719 = vmatprep.subr.bf16.mxu1 %v718_v11 }
  0x34   :  { %p749_p4 = pnand %p748_p3, %p742_p0 }
  0x36   :  { %721 = vmatpush3.bf16.msra.mxu1 %v720_v16 }
  0x37   :  { %723 = vmatprep.subr.bf16.mxu1 %v722_v17 }
  0x3a   :  { %725 = vmatpush3.bf16.msra.mxu1 %v724_v22 }
  0x3b   :  { %727 = vmatprep.subr.bf16.mxu1 %v726_v23 }
  0x3e   :  { %729 = vmatpush3.bf16.msra.mxu1 %v728_v28 }
  0x3f   :  { %731 = vmatprep.subr.bf16.mxu1 %v730_v29 }
  0x42   :  { %733 = vmatpush3.bf16.msra.mxu1 %v732_v32 }
  0x45   :  { %408 = vmatmul.mubr.f32.vlgmr.msra.gmra.mrb[2].mxu1 %v22_v33 }
  0xda   :  { %v196_v34 = vpop.f32.mrb[0].mxu0 }
  0xdb   :  { %v627_v35 = vpop.f32.mrb[1].mxu0 }
  0xf8   :  { %v545_v36 = vpop.f32.mrb[0].mxu1 }
  0xf9   :  { %v546_v37 = vpop.f32.mrb[1].mxu1 }
  0xfa   :  { %v547_v38 = vadd.f32 %v546_v37, %v545_v36  ;;  %v580_v39 = vpop.f32.mrb[2].mxu0 }
  0xfb   :  { %v581_v40 = vpop.f32.mrb[3].mxu0 }
  0xfc   :  { %v270_v41 = vadd.f32 %v547_v38, %v196_v34  ;;  %v582_v42 = vadd.f32 %v581_v40, %v580_v39 }
  0xfe   :  { %v340_v43 = vadd.f32 %v582_v42, %v270_v41  ;;  %v479_v44 = vpop.f32.mrb[4].mxu0 }
  0xff   :  { %v634_v45 = vpop.f32.mrb[5].mxu0 }
 0x118   :  { %v615_v46 = vpop.f32.mrb[2].mxu1 }
 0x119   :  { %v616_v47 = vpop.f32.mrb[3].mxu1 }
 0x11a   :  { %v617_v48 = vadd.f32 %v616_v47, %v615_v46 }
 0x11c   :  { %v410_v49 = vadd.f32 %v617_v48, %v340_v43 }
 0x11e   :  { %v480_v51 = vadd.f32 %v479_v44, %v410_v49 }
 0x120   :  { %v490_v52 = vadd.f32 %v509_v50, %v480_v51 }
 0x122   :  { %492 = vst.msk [vmem:[#allocation2] sm:$0xff] %vm491_vm2, %v490_v52 }
 0x123   :  { %752 = shalt.err (!%p749_p4)
}
 0x124   :  { %s753_s20 = scalar_lea.hbm %s1145_s4, 128 }
 0x125   :  { %p754_p5 = scmp.ne.s32.totalorder %s1145_s4, %s753_s20  ;;  %p757_p6 = scmp.lt.u32.totalorder %s753_s20, %s1145_s4 }
 0x127   :  { %p759_p7 = pnand %p757_p6, %p754_p5 }
 0x129   :  { %762 = shalt.err (!%p759_p7)
}
 0x12a   :  { %502 = dma.vmem_to_hbm [thread:$0]  %s500_s16, 128, %s1145_s4, [#allocation3]  }
 0x12b   :  { %763 = dma.done.wait [#allocation3], 128  }
 0x12c   :  { %764 = vsyncadd [#allocation3], 4294967168 }
 0x12d   :  { %506 = vsyncpa [#allocation3], 1 }

</bundles_post_ra>
